<compile_context>
chip_gen: v6e
topology: v6e:2x2x1
jax: 0.10.0
libtpu: 0.0.40
codegen_flags: <defaults>
</compile_context>

<pallas_src>
import functools

import numpy as np
import jax
import jax.numpy as jnp
from jax import lax
from jax.experimental import pallas as pl
from jax.experimental.pallas import tpu as pltpu


def _sigmoid(x):
    # One EUP push (tanh) instead of exp + reciprocal.
    return 0.5 * jnp.tanh(0.5 * x) + 0.5


def _upsample_kernel(lhs_ref, w_ref, o_ref):
    # lhs_ref: (Rb, KPAD)    bf16  per-(n,h) input strip; column KC == 1.0 (bias lane)
    # w_ref:   (KPAD, 4*CW)  bf16  banded weights (+ bias row at KC),
    #                              col = packed_channel*W + w_out,
    #                              packed channels = [c1_lin | c2_lin | c1_gate | c2_gate]
    # o_ref:   (Rb, CW)            gated pre-pixel-shuffle output, col = c*W + w_out
    cw = o_ref.shape[-1]  # = half * W = 128 for this config

    # Single MXU matmul (bf16 in, f32 accumulate); bias rides on contraction col KC.
    acc = jnp.dot(lhs_ref[...], w_ref[...], preferred_element_type=jnp.float32)

    # GLU on both branches, then the final gated product.  Channel-major packing
    # keeps every slice 128-lane aligned (no masked selects / cross-lane shuffles).
    lin, gate = acc[:, :2 * cw], acc[:, 2 * cw:]
    g = lin * _sigmoid(gate)                 # [glu(conv1) | glu(conv2)]
    out = g[:, :cw] * _sigmoid(g[:, cw:])    # glu1 * sigmoid(glu2)
    o_ref[...] = out.astype(o_ref.dtype)     # unmasked lane-dense (Rb, 128) store


def prepare_upsample_params(w1, b1, w2, b2, *, W, padding=1):
    """One-time, host-side weight banding (weights are static for inference).

    Returns (rhs_banded_bf16, params) where rhs_banded_bf16 is the ready
    (KPAD, 2*Cout*W_out) bf16 matrix consumed directly by the pallas_call.
    """
    w1 = np.asarray(w1, np.float32)
    w2 = np.asarray(w2, np.float32)
    b1 = np.asarray(b1, np.float32)
    b2 = np.asarray(b2, np.float32)

    Cin, Cout, K, _ = w1.shape
    half = Cout // 2                     # channels surviving GLU (pre-pixel-shuffle)
    assert half % 4 == 0, "GLU<->PixelShuffle commutation needs half % 4 == 0"
    eff_pad = K - 1 - padding            # stride=1: equivalent cross-correlation pad
    Wp = W + 2 * eff_pad
    W_out = Wp - K + 1
    n_ch = 2 * Cout

    KC = K * Wp * Cin                            # contraction length (3*18*4 = 216)
    KPAD = ((KC + 1 + 127) // 128) * 128         # pad to full MXU contraction, +1 bias row

    def to_corr_weight(w_pt):
        # ConvTranspose2d weight (Cin, Cout, K, K) -> cross-correlation weight
        # (K, K, Cin, Cout), spatially flipped.
        return np.transpose(np.flip(w_pt, axis=(2, 3)), (2, 3, 0, 1))

    wk1, wk2 = to_corr_weight(w1), to_corr_weight(w2)
    # Packed channel order so the in-kernel GLU/gating slices are 128-lane aligned.
    w_pack = np.concatenate(
        [wk1[..., :half], wk2[..., :half], wk1[..., half:], wk2[..., half:]],
        axis=-1)                                              # (K, K, Cin, 2*Cout)

    # Banded RHS: rhs[(kh, w_in, ci), (ch, w_out)] = w_pack[kh, w_in - w_out, ci, ch]
    # for 0 <= w_in - w_out < K else 0.   sel[kw, w_in, w_out] = [w_in == w_out + kw].
    sel = np.stack([np.eye(Wp, W_out, k=-kw, dtype=np.float32) for kw in range(K)])
    band = np.einsum("hkcd,kiw->hicdw", w_pack, sel)          # (K, Wp, Cin, n_ch, W_out)

    rhs = np.zeros((KPAD, n_ch * W_out), np.float32)
    rhs[:KC] = band.reshape(KC, n_ch * W_out)
    # Fold the bias into the dead padding region: LHS column KC is 1.0.
    b_pack = np.concatenate([b1[:half], b2[:half], b1[half:], b2[half:]])
    rhs[KC] = np.repeat(b_pack, W_out)

    params = dict(K=K, Cin=Cin, Cout=Cout, half=half, padding=padding,
                  KC=KC, KPAD=KPAD, W=W, Wp=Wp, W_out=W_out, n_ch=n_ch)
    return jnp.asarray(rhs, dtype=jnp.bfloat16), params


def _num_row_blocks(n_rows, requested=None):
    """Row-split across TensorCores.

    nb=1 by default: at small R the kernel is latency/fixed-overhead bound and a
    split only duplicates the RHS DMA while halving an already tiny M.  Only shard
    across v7x's 2 TCs when each core gets a few hundred bf16-sublane-aligned rows.
    """
    if requested is not None:
        return requested
    if n_rows < 512 or n_rows % 2 or (n_rows // 2) % 16:
        return 1
    try:
        kind = jax.devices()[0].device_kind.lower()
    except Exception:
        return 1
    return 2 if any(t in kind for t in ("v7", "7x")) else 1


def upsample_block_forward(x_nchw, rhs_banded, params, *, num_row_blocks=None):
    """x_nchw: (N, Cin, H, W); rhs_banded/params from prepare_upsample_params."""
    N, Cin, H, W = x_nchw.shape
    K, half = params["K"], params["half"]
    KC, KPAD = params["KC"], params["KPAD"]
    Wp, W_out, n_ch = params["Wp"], params["W_out"], params["n_ch"]
    assert Cin == params["Cin"] and W == params["W"]
    eff_pad = K - 1 - params["padding"]
    H_out = H + 2 * eff_pad - K + 1

    # -------- wrapper-side activation prep (bf16 early: halves strip HBM traffic) --
    x = jnp.transpose(x_nchw, (0, 2, 3, 1)).astype(jnp.bfloat16)      # NCHW -> NHWC
    x_pad = jnp.pad(x, ((0, 0), (eff_pad, eff_pad), (eff_pad, eff_pad), (0, 0)))

    # LHS strips: for each output row (n, h) take the K padded input rows it
    # touches, flattened as (kh, w_in, ci); zero-pad contraction KC -> KPAD and
    # set column KC to 1.0 so the bias row of the RHS is picked up by the matmul.
    strips = jnp.concatenate(
        [x_pad[:, kh:kh + H_out].reshape(N, H_out, Wp * Cin) for kh in range(K)],
        axis=-1)
    lhs = strips.reshape(N * H_out, KC)
    lhs = jnp.pad(lhs, ((0, 0), (0, KPAD - KC)))
    lhs = lhs.at[:, KC].set(1.0)                                      # bias lane

    # -------- Pallas call -----------------------------------------------------------
    R = N * H_out                   # output rows (n, h)
    CW = half * W_out               # 8*16 = 128 lane-dense output columns (c, w)
    nb = _num_row_blocks(R, num_row_blocks)
    Rb = R // nb

    out_itemsize = jnp.dtype(x_nchw.dtype).itemsize
    cost = pl.CostEstimate(
        flops=2 * R * KPAD * n_ch * W_out,
        transcendentals=3 * R * CW,
        bytes_accessed=R * KPAD * 2 + KPAD * n_ch * W_out * 2 + R * CW * out_itemsize)
    vmem_need = 2 * (Rb * KPAD * 2 + KPAD * n_ch * W_out * 2 + Rb * CW * 4)
    vmem_limit = int(min(64 * 1024 * 1024, max(4 * 1024 * 1024, 4 * vmem_need)))

    out_rows = pl.pallas_call(
        _upsample_kernel,
        out_shape=jax.ShapeDtypeStruct((R, CW), x_nchw.dtype),
        grid_spec=pltpu.PrefetchScalarGridSpec(
            num_scalar_prefetch=0,
            grid=(nb,),
            in_specs=[
                pl.BlockSpec((Rb, KPAD), lambda i: (i, 0)),
                pl.BlockSpec((KPAD, n_ch * W_out), lambda i: (0, 0)),
            ],
            out_specs=pl.BlockSpec((Rb, CW), lambda i: (i, 0)),
        ),
        compiler_params=pltpu.CompilerParams(
            dimension_semantics=("parallel",),
            vmem_limit_bytes=vmem_limit),
        cost_estimate=cost,
    )(lhs, rhs_banded)

    # -------- un-flatten + PixelShuffle(2) + NCHW (pure data movement) ---------------
    # out_rows[n*H + h, c*W + w] -> pre-shuffle gated map (N, half, H, W) in NCHW.
    # (Could be done in bf16 to halve traffic if downstream tolerates it.)
    pre = jnp.transpose(out_rows.reshape(N, H_out, half, W_out), (0, 2, 1, 3))
    y = pre.reshape(N, half // 4, 2, 2, H_out, W_out)
    y = jnp.transpose(y, (0, 1, 4, 2, 5, 3)).reshape(N, half // 4, 2 * H_out, 2 * W_out)
    return y


def ref_forward(x_nchw, w1, b1, w2, b2):
    """Pure-JAX (f32) reference mirroring the PyTorch op sequence exactly (NCHW)."""
    def conv_transpose(x, w_pt, b):
        wt = jnp.transpose(jnp.flip(w_pt, axis=(2, 3)), (1, 0, 2, 3))  # OIHW
        y = lax.conv_general_dilated(x, wt, window_strides=(1, 1),
                                     padding=((1, 1), (1, 1)),
                                     dimension_numbers=('NCHW', 'OIHW', 'NCHW'))
        return y + b[None, :, None, None]

    def pixel_shuffle(x, r=2):
        n, c, h, w = x.shape
        x = x.reshape(n, c // (r * r), r, r, h, w)
        x = jnp.transpose(x, (0, 1, 4, 2, 5, 3))
        return x.reshape(n, c // (r * r), h * r, w * r)

    def glu(x):
        c = x.shape[1] // 2
        return x[:, :c] * jax.nn.sigmoid(x[:, c:])

    a = glu(pixel_shuffle(conv_transpose(x_nchw, w1, b1)))
    g = glu(pixel_shuffle(conv_transpose(x_nchw, w2, b2)))
    return a * jax.nn.sigmoid(g)


if __name__ == "__main__":
    N, DIM_IN, DIM_OUT, H, W = 2, 4, 16, 16, 16
    KSIZE = 3  # stride=1, padding=1, bias=True

    key = jax.random.PRNGKey(0)
    k1, k2, k3, k4, k5 = jax.random.split(key, 5)
    scale = 0.1
    x = jax.random.normal(k1, (N, DIM_IN, H, W), jnp.float32)
    w1 = scale * jax.random.normal(k2, (DIM_IN, DIM_OUT, KSIZE, KSIZE), jnp.float32)
    w2 = scale * jax.random.normal(k3, (DIM_IN, DIM_OUT, KSIZE, KSIZE), jnp.float32)
    b1 = scale * jax.random.normal(k4, (DIM_OUT,), jnp.float32)
    b2 = scale * jax.random.normal(k5, (DIM_OUT,), jnp.float32)

    # One-time weight banding (init-time / host-side); per-call forward is compiled once.
    rhs_banded, params = prepare_upsample_params(w1, b1, w2, b2, W=W, padding=1)
    fwd = jax.jit(functools.partial(upsample_block_forward, params=params))

    out = jax.block_until_ready(fwd(x, rhs_banded))
    ref = ref_forward(x, w1, b1, w2, b2)

    assert out.shape == (N, DIM_OUT // 8, 2 * H, 2 * W), out.shape
    # bf16 MXU operands (f32 accumulate) -> tolerance loosened vs the f32 reference.
    np.testing.assert_allclose(np.asarray(out), np.asarray(ref), rtol=5e-3, atol=5e-3)
    print("KERNEL_OK")
</pallas_src>

<mosaic_0001>
module attributes {stable_mosaic.version = 11 : i64} {
  func.func @_upsample_kernel(%arg0: i32, %arg1: memref<32x256xbf16, #tpu.memory_space<vmem>>, %arg2: memref<256x512xbf16, #tpu.memory_space<vmem>>, %arg3: memref<32x128xf32, #tpu.memory_space<vmem>>) attributes {dimension_semantics = [#tpu.dimension_semantics<parallel>], iteration_bounds = array<i64: 1>, scalar_prefetch = 0 : i64, scratch_operands = 0 : i64, tpu.core_type = #tpu.core_type<tc>, window_params = [{transform_indices = @transform_0, window_bounds = array<i64: 32, 256>}, {pipeline_mode = #tpu.pipeline_mode<synchronous>, transform_indices = @transform_1, window_bounds = array<i64: 256, 512>}, {transform_indices = @transform_2, window_bounds = array<i64: 32, 128>}]} {
    %c0 = arith.constant 0 : index
    %c0_0 = arith.constant 0 : index
    %0 = vector.load %arg1[%c0, %c0_0] : memref<32x256xbf16, #tpu.memory_space<vmem>>, vector<32x256xbf16>
    %c0_1 = arith.constant 0 : index
    %c0_2 = arith.constant 0 : index
    %1 = vector.load %arg2[%c0_1, %c0_2] : memref<256x512xbf16, #tpu.memory_space<vmem>>, vector<256x512xbf16>
    %cst = arith.constant dense<0.000000e+00> : vector<32x512xf32>
    %2 = tpu.matmul %0, %1, %cst {dimension_numbers = #tpu.dot_dimension_numbers<[1], [0], [0], [1], [0, 0, 1, 1], [], []>} : vector<32x256xbf16>, vector<256x512xbf16>, vector<32x512xf32> -> vector<32x512xf32>
    %3 = vector.extract_strided_slice %2 {offsets = [0, 0], sizes = [32, 256], strides = [1, 1]} : vector<32x512xf32> to vector<32x256xf32>
    %4 = vector.extract_strided_slice %2 {offsets = [0, 256], sizes = [32, 256], strides = [1, 1]} : vector<32x512xf32> to vector<32x256xf32>
    %cst_3 = arith.constant 5.000000e-01 : f32
    %5 = vector.broadcast %cst_3 : f32 to vector<32x256xf32>
    %6 = arith.mulf %5, %4 : vector<32x256xf32>
    %7 = math.tanh %6 : vector<32x256xf32>
    %cst_4 = arith.constant 5.000000e-01 : f32
    %8 = vector.broadcast %cst_4 : f32 to vector<32x256xf32>
    %9 = arith.mulf %8, %7 : vector<32x256xf32>
    %cst_5 = arith.constant 5.000000e-01 : f32
    %10 = vector.broadcast %cst_5 : f32 to vector<32x256xf32>
    %11 = arith.addf %9, %10 : vector<32x256xf32>
    %12 = arith.mulf %3, %11 : vector<32x256xf32>
    %13 = vector.extract_strided_slice %12 {offsets = [0, 0], sizes = [32, 128], strides = [1, 1]} : vector<32x256xf32> to vector<32x128xf32>
    %14 = vector.extract_strided_slice %12 {offsets = [0, 128], sizes = [32, 128], strides = [1, 1]} : vector<32x256xf32> to vector<32x128xf32>
    %cst_6 = arith.constant 5.000000e-01 : f32
    %15 = vector.broadcast %cst_6 : f32 to vector<32x128xf32>
    %16 = arith.mulf %15, %14 : vector<32x128xf32>
    %17 = math.tanh %16 : vector<32x128xf32>
    %cst_7 = arith.constant 5.000000e-01 : f32
    %18 = vector.broadcast %cst_7 : f32 to vector<32x128xf32>
    %19 = arith.mulf %18, %17 : vector<32x128xf32>
    %cst_8 = arith.constant 5.000000e-01 : f32
    %20 = vector.broadcast %cst_8 : f32 to vector<32x128xf32>
    %21 = arith.addf %19, %20 : vector<32x128xf32>
    %22 = arith.mulf %13, %21 : vector<32x128xf32>
    %c0_9 = arith.constant 0 : index
    %c0_10 = arith.constant 0 : index
    %23 = vector.load %arg3[%c0_9, %c0_10] : memref<32x128xf32, #tpu.memory_space<vmem>>, vector<32x128xf32>
    tpu.vector_store %arg3[%c0_9, %c0_10], %22 {strides = array<i32>} : memref<32x128xf32, #tpu.memory_space<vmem>>, vector<32x128xf32>,
    return
  }
  func.func @transform_0(%arg0: i32) -> (i32, i32) {
    %c0_i32 = arith.constant 0 : i32
    %c0_i32_0 = arith.constant 0 : i32
    return %arg0, %c0_i32 : i32, i32
  }
  func.func @transform_1(%arg0: i32) -> (i32, i32) {
    %c0_i32 = arith.constant 0 : i32
    %c0_i32_0 = arith.constant 0 : i32
    %c0_i32_1 = arith.constant 0 : i32
    return %c0_i32, %c0_i32_0 : i32, i32
  }
  func.func @transform_2(%arg0: i32) -> (i32, i32) {
    %c0_i32 = arith.constant 0 : i32
    %c0_i32_0 = arith.constant 0 : i32
    return %arg0, %c0_i32 : i32, i32
  }
}

</mosaic_0001>

<bundles_post_ra>
// kernel: upsample_block_forward.1
= control target key start
LH: loop header
LB: loop body
LE: loop exit
PB: predicated region body
PF: predicated region fallthrough
CT: control target
= control target key end

     0   :  { %s1018_s1 = inlined_call_operand.vmem [shape: bf16[256,512], index: 1, kind: input, shape index: {}]   ;;  %s1019_s0 = inlined_call_operand.vmem [shape: bf16[32,256], index: 0, kind: input, shape index: {}]   ;;  %s1020_s2 = inlined_call_operand.vmem [shape: f32[32,128], index: 2, kind: output, shape index: {}]  }
   0x1   :  { %v661_v0 = vld [vmem:[%s1018_s1 + $0xec] ss:$16 sps:$4 sm:$0xff]   ;;  %v663_v1 = vld [vmem:[%s1018_s1 + $0xe8] ss:$16 sps:$4 sm:$0xff]   ;;  %v673_v5 = vld [vmem:[%s1018_s1 + $0xe4] ss:$16 sps:$4 sm:$0xff]  }
   0x2   :  { %472 = vmatprep.subr.bf16.mxu1 %v661_v0  ;;  %v664_v2 = vld [vmem:[%s1018_s1 + $0xcc] ss:$16 sps:$4 sm:$0xff]   ;;  %v666_v3 = vld [vmem:[%s1018_s1 + $0xc8] ss:$16 sps:$4 sm:$0xff]   ;;  %v675_v6 = vld [vmem:[%s1018_s1 + $0xe0] ss:$16 sps:$4 sm:$0xff]   ;;  %419 = vmatprep.subr.bf16.mxu0 %v673_v5 }
   0x3   :  { %473 = vmatpush1.bf16.msra.mxu1 %v663_v1  ;;  %v667_v4 = vld [vmem:[%s1018_s1 + $0xac] ss:$16 sps:$4 sm:$0xff]   ;;  %v669_v7 = vld [vmem:[%s1018_s1 + $0xa8] ss:$16 sps:$4 sm:$0xff]   ;;  %v679_v9 = vld [vmem:[%s1018_s1 + $0xc4] ss:$16 sps:$4 sm:$0xff]   ;;  %420 = vmatpush1.bf16.msra.mxu0 %v675_v6 }
   0x4   :  { %474 = vmatprep.subr.bf16.mxu1 %v664_v2  ;;  %v670_v8 = vld [vmem:[%s1018_s1 + $0x8c] ss:$16 sps:$4 sm:$0xff]   ;;  %v681_v10 = vld [vmem:[%s1018_s1 + $0xc0] ss:$16 sps:$4 sm:$0xff]   ;;  %421 = vmatprep.subr.bf16.mxu0 %v679_v9  ;;  %v672_v11 = vld [vmem:[%s1018_s1 + $0x88] ss:$16 sps:$4 sm:$0xff]  }
   0x5   :  { %v685_v12 = vld [vmem:[%s1018_s1 + $0xa4] ss:$16 sps:$4 sm:$0xff]   ;;  %v676_v13 = vld [vmem:[%s1018_s1 + $0x6c] ss:$16 sps:$4 sm:$0xff]   ;;  %v687_v14 = vld [vmem:[%s1018_s1 + $0xa0] ss:$16 sps:$4 sm:$0xff]  }
   0x6   :  { %v691_v15 = vld [vmem:[%s1018_s1 + $0x84] ss:$16 sps:$4 sm:$0xff]   ;;  %v678_v16 = vld [vmem:[%s1018_s1 + $0x68] ss:$16 sps:$4 sm:$0xff]   ;;  %v682_v17 = vld [vmem:[%s1018_s1 + $0x4c] ss:$16 sps:$4 sm:$0xff]  }
   0x7   :  { %475 = vmatpush1.bf16.msra.mxu1 %v666_v3  ;;  %422 = vmatpush1.bf16.msra.mxu0 %v681_v10  ;;  %v693_v18 = vld [vmem:[%s1018_s1 + $0x80] ss:$16 sps:$4 sm:$0xff]   ;;  %v697_v19 = vld [vmem:[%s1018_s1 + $0x64] ss:$16 sps:$4 sm:$0xff]   ;;  %v684_v20 = vld [vmem:[%s1018_s1 + $0x48] ss:$16 sps:$4 sm:$0xff]  }
   0x8   :  { %476 = vmatprep.subr.bf16.mxu1 %v667_v4  ;;  %423 = vmatprep.subr.bf16.mxu0 %v685_v12  ;;  %v688_v21 = vld [vmem:[%s1018_s1 + $0x2c] ss:$16 sps:$4 sm:$0xff]   ;;  %v699_v22 = vld [vmem:[%s1018_s1 + $0x60] ss:$16 sps:$4 sm:$0xff]   ;;  %v703_v23 = vld [vmem:[%s1018_s1 + $0x44] ss:$16 sps:$4 sm:$0xff]  }
   0x9   :  { %v690_v24 = vld [vmem:[%s1018_s1 + $0x28] ss:$16 sps:$4 sm:$0xff]   ;;  %v694_v25 = vld [vmem:[%s1018_s1 + $0xc] ss:$16 sps:$4 sm:$0xff]   ;;  %v705_v26 = vld [vmem:[%s1018_s1 + $0x40] ss:$16 sps:$4 sm:$0xff]  }
   0xa   :  { %v709_v27 = vld [vmem:[%s1018_s1 + $0x24] ss:$16 sps:$4 sm:$0xff]   ;;  %v696_v28 = vld [vmem:[%s1018_s1 + $0x8] ss:$16 sps:$4 sm:$0xff]   ;;  %v700_v29 = vld [vmem:[%s1018_s1 + $0x1ec] ss:$16 sps:$4 sm:$0xff]  }
   0xb   :  { %477 = vmatpush1.bf16.msra.mxu1 %v669_v7  ;;  %424 = vmatpush1.bf16.msra.mxu0 %v687_v14  ;;  %v711_v30 = vld [vmem:[%s1018_s1 + $0x20] ss:$16 sps:$4 sm:$0xff]   ;;  %v715_v31 = vld [vmem:[%s1018_s1 + $0x4] ss:$16 sps:$4 sm:$0xff]   ;;  %v702_v32 = vld [vmem:[%s1018_s1 + $0x1e8] ss:$16 sps:$4 sm:$0xff]  }
   0xc   :  { %478 = vmatprep.subr.bf16.mxu1 %v670_v8  ;;  %425 = vmatprep.subr.bf16.mxu0 %v691_v15  ;;  %v706_v33 = vld [vmem:[%s1018_s1 + $0x1cc] ss:$16 sps:$4 sm:$0xff]   ;;  %v717_v34 = vld [vmem:[%s1018_s1] ss:$16 sps:$4 sm:$0xff]   ;;  %v721_v35 = vld [vmem:[%s1018_s1 + $0x1e4] ss:$16 sps:$4 sm:$0xff]  }
   0xd   :  { %v708_v36 = vld [vmem:[%s1018_s1 + $0x1c8] ss:$16 sps:$4 sm:$0xff]   ;;  %v712_v37 = vld [vmem:[%s1018_s1 + $0x1ac] ss:$16 sps:$4 sm:$0xff]   ;;  %v723_v38 = vld [vmem:[%s1018_s1 + $0x1e0] ss:$16 sps:$4 sm:$0xff]  }
   0xe   :  { %v727_v39 = vld [vmem:[%s1018_s1 + $0x1c4] ss:$16 sps:$4 sm:$0xff]   ;;  %v714_v40 = vld [vmem:[%s1018_s1 + $0x1a8] ss:$16 sps:$4 sm:$0xff]   ;;  %v718_v42 = vld [vmem:[%s1018_s1 + $0x18c] ss:$16 sps:$4 sm:$0xff]  }
   0xf   :  { %479 = vmatpush1.bf16.msra.mxu1 %v672_v11  ;;  %426 = vmatpush1.bf16.msra.mxu0 %v693_v18  ;;  %v750_v41 = vld [vmem:[%s1019_s0 + $0x4] ss:$8 sps:$4 sm:$0xff]   ;;  %v729_v43 = vld [vmem:[%s1018_s1 + $0x1c0] ss:$16 sps:$4 sm:$0xff]   ;;  %v720_v45 = vld [vmem:[%s1018_s1 + $0x188] ss:$16 sps:$4 sm:$0xff]  }
  0x10   :  { %480 = vmatprep.subr.bf16.mxu1 %v676_v13  ;;  %427 = vmatprep.subr.bf16.mxu0 %v697_v19  ;;  %v733_v44 = vld [vmem:[%s1018_s1 + $0x1a4] ss:$16 sps:$4 sm:$0xff]   ;;  %v724_v46 = vld [vmem:[%s1018_s1 + $0x16c] ss:$16 sps:$4 sm:$0xff]   ;;  %v735_v47 = vld [vmem:[%s1018_s1 + $0x1a0] ss:$16 sps:$4 sm:$0xff]  }
  0x11   :  { %504 = vmatprep.mubr.bf16.mxu1 %v750_v41  ;;  %451 = vmatprep.mubr.bf16.mxu0 %v750_v41  ;;  %v739_v48 = vld [vmem:[%s1018_s1 + $0x184] ss:$16 sps:$4 sm:$0xff]   ;;  %v726_v49 = vld [vmem:[%s1018_s1 + $0x168] ss:$16 sps:$4 sm:$0xff]   ;;  %v730_v50 = vld [vmem:[%s1018_s1 + $0x14c] ss:$16 sps:$4 sm:$0xff]  }
  0x12   :  { %v741_v51 = vld [vmem:[%s1018_s1 + $0x180] ss:$16 sps:$4 sm:$0xff]   ;;  %v745_v52 = vld [vmem:[%s1018_s1 + $0x164] ss:$16 sps:$4 sm:$0xff]   ;;  %v732_v53 = vld [vmem:[%s1018_s1 + $0x148] ss:$16 sps:$4 sm:$0xff]  }
  0x13   :  { %481 = vmatpush1.bf16.msra.mxu1 %v678_v16  ;;  %428 = vmatpush1.bf16.msra.mxu0 %v699_v22  ;;  %v736_v54 = vld [vmem:[%s1018_s1 + $0x12c] ss:$16 sps:$4 sm:$0xff]   ;;  %v747_v55 = vld [vmem:[%s1018_s1 + $0x160] ss:$16 sps:$4 sm:$0xff]   ;;  %v751_v56 = vld [vmem:[%s1018_s1 + $0x144] ss:$16 sps:$4 sm:$0xff]  }
  0x14   :  { %482 = vmatprep.subr.bf16.mxu1 %v682_v17  ;;  %429 = vmatprep.subr.bf16.mxu0 %v703_v23  ;;  %v738_v57 = vld [vmem:[%s1018_s1 + $0x128] ss:$16 sps:$4 sm:$0xff]   ;;  %v742_v58 = vld [vmem:[%s1018_s1 + $0x10c] ss:$16 sps:$4 sm:$0xff]   ;;  %v753_v59 = vld [vmem:[%s1018_s1 + $0x140] ss:$16 sps:$4 sm:$0xff]  }
  0x15   :  { %v754_v60 = vld [vmem:[%s1018_s1 + $0x124] ss:$16 sps:$4 sm:$0xff]   ;;  %v744_v61 = vld [vmem:[%s1018_s1 + $0x108] ss:$16 sps:$4 sm:$0xff]   ;;  %v756_v62 = vld [vmem:[%s1018_s1 + $0x120] ss:$16 sps:$4 sm:$0xff]  }
  0x16   :  { %v748_v63 = vld [vmem:[%s1019_s0] ss:$8 sps:$4 sm:$0xff]   ;;  %v760_v0 = vld [vmem:[%s1018_s1 + $0x104] ss:$16 sps:$4 sm:$0xff]   ;;  %v759_v3 = vld [vmem:[%s1019_s0 + $0x10] ss:$8 sps:$4 sm:$0xff]  }
  0x17   :  { %483 = vmatpush1.bf16.msra.mxu1 %v684_v20  ;;  %430 = vmatpush1.bf16.msra.mxu0 %v705_v26  ;;  %v757_v1 = vld [vmem:[%s1019_s0 + $0x14] ss:$8 sps:$4 sm:$0xff]   ;;  %v762_v2 = vld [vmem:[%s1018_s1 + $0x100] ss:$16 sps:$4 sm:$0xff]  }
  0x18   :  { %484 = vmatprep.subr.bf16.mxu1 %v688_v21  ;;  %431 = vmatprep.subr.bf16.mxu0 %v709_v27 }
  0x1b   :  { %485 = vmatpush1.bf16.msra.mxu1 %v690_v24  ;;  %432 = vmatpush1.bf16.msra.mxu0 %v711_v30 }
  0x1c   :  { %486 = vmatprep.subr.bf16.mxu1 %v694_v25  ;;  %433 = vmatprep.subr.bf16.mxu0 %v715_v31 }
  0x1f   :  { %487 = vmatpush1.bf16.msra.mxu1 %v696_v28  ;;  %434 = vmatpush1.bf16.msra.mxu0 %v717_v34 }
  0x20   :  { %488 = vmatprep.subr.bf16.mxu1 %v700_v29  ;;  %435 = vmatprep.subr.bf16.mxu0 %v721_v35 }
  0x23   :  { %489 = vmatpush2.bf16.msra.mxu1 %v702_v32  ;;  %436 = vmatpush2.bf16.msra.mxu0 %v723_v38 }
  0x24   :  { %490 = vmatprep.subr.bf16.mxu1 %v706_v33  ;;  %437 = vmatprep.subr.bf16.mxu0 %v727_v39 }
  0x27   :  { %491 = vmatpush2.bf16.msra.mxu1 %v708_v36  ;;  %438 = vmatpush2.bf16.msra.mxu0 %v729_v43 }
  0x28   :  { %492 = vmatprep.subr.bf16.mxu1 %v712_v37  ;;  %439 = vmatprep.subr.bf16.mxu0 %v733_v44 }
  0x2b   :  { %493 = vmatpush2.bf16.msra.mxu1 %v714_v40  ;;  %440 = vmatpush2.bf16.msra.mxu0 %v735_v47 }
  0x2c   :  { %494 = vmatprep.subr.bf16.mxu1 %v718_v42  ;;  %441 = vmatprep.subr.bf16.mxu0 %v739_v48 }
  0x2f   :  { %495 = vmatpush2.bf16.msra.mxu1 %v720_v45  ;;  %442 = vmatpush2.bf16.msra.mxu0 %v741_v51 }
  0x30   :  { %496 = vmatprep.subr.bf16.mxu1 %v724_v46  ;;  %443 = vmatprep.subr.bf16.mxu0 %v745_v52 }
  0x33   :  { %497 = vmatpush2.bf16.msra.mxu1 %v726_v49  ;;  %444 = vmatpush2.bf16.msra.mxu0 %v747_v55 }
  0x34   :  { %498 = vmatprep.subr.bf16.mxu1 %v730_v50  ;;  %445 = vmatprep.subr.bf16.mxu0 %v751_v56 }
  0x37   :  { %499 = vmatpush2.bf16.msra.mxu1 %v732_v53  ;;  %446 = vmatpush2.bf16.msra.mxu0 %v753_v59 }
  0x38   :  { %500 = vmatprep.subr.bf16.mxu1 %v736_v54  ;;  %447 = vmatprep.subr.bf16.mxu0 %v754_v60 }
  0x3b   :  { %501 = vmatpush2.bf16.msra.mxu1 %v738_v57  ;;  %448 = vmatpush2.bf16.msra.mxu0 %v756_v62 }
  0x3c   :  { %502 = vmatprep.subr.bf16.mxu1 %v742_v58  ;;  %449 = vmatprep.subr.bf16.mxu0 %v760_v0 }
  0x3f   :  { %503 = vmatpush2.bf16.msra.mxu1 %v744_v61  ;;  %450 = vmatpush2.bf16.msra.mxu0 %v762_v2 }
  0x42   :  { %505 = vmatmul.mubr.bf16.vlgmr.msra.gmra.mxu1 %v748_v63  ;;  %452 = vmatmul.mubr.bf16.vlgmr.msra.gmra.mxu0 %v748_v63 }
  0x43   :  { %514 = vmatprep.mubr.bf16.mxu1 %v757_v1  ;;  %461 = vmatprep.mubr.bf16.mxu0 %v757_v1 }
  0x4a   :  { %515 = vmatmul.mubr.bf16.gmra.mxu1 %v759_v3  ;;  %462 = vmatmul.mubr.bf16.gmra.mxu0 %v759_v3 }
 0x102   :  { %v506_v4 = vpop.f32.mrf.mxu1  ;;  %v453_v9 = vpop.f32.mrf.mxu0 }
 0x103   :  { %v525_v18 = vmul.f32 0.5, %v506_v4 }
 0x104   :  { %v508_v5 = vpop.f32.mrf.mxu1  ;;  %v455_v13 = vpop.f32.mrf.mxu0 }
 0x105   :  { %v526_v6 = vmul.f32 0.5, %v508_v5 }
 0x106   :  { %v510_v7 = vpop.f32.mrf.mxu1  ;;  %v457_v17 = vpop.f32.mrf.mxu0 }
 0x107   :  { %763 = vtanh.f32 %v526_v6  ;;  %v527_v22 = vmul.f32 0.5, %v510_v7 }
 0x108   :  { %v512_v8 = vpop.f32.mrf.mxu1  ;;  %v459_v21 = vpop.f32.mrf.mxu0 }
 0x109   :  { %v528_v10 = vmul.f32 0.5, %v512_v8 }
 0x10a   :  { %v516_v11 = vpop.f32.mrf.mxu1  ;;  %v463_v27 = vpop.f32.mrf.mxu0 }
 0x10b   :  { %765 = vtanh.f32 %v528_v10  ;;  %v529_v26 = vmul.f32 0.5, %v516_v11 }
 0x10c   :  { %v518_v12 = vpop.f32.mrf.mxu1  ;;  %v465_v34 = vpop.f32.mrf.mxu0 }
 0x10d   :  { %v530_v14 = vmul.f32 0.5, %v518_v12 }
 0x10e   :  { %v520_v15 = vpop.f32.mrf.mxu1  ;;  %v467_v40 = vpop.f32.mrf.mxu0 }
 0x10f   :  { %767 = vtanh.f32 %v530_v14  ;;  %v531_v33 = vmul.f32 0.5, %v520_v15 }
 0x110   :  { %v522_v16 = vpop.f32.mrf.mxu1  ;;  %v469_v46 = vpop.f32.mrf.mxu0 }
 0x111   :  { %v532_v19 = vmul.f32 0.5, %v522_v16 }
 0x113   :  { %769 = vtanh.f32 %v532_v19 }
 0x114   :  { %v764_v20 = vpop.eup %763  ;;  %771 = vtanh.f32 %v525_v18 }
 0x115   :  { %v542_v23 = vmul.f32 0.5, %v764_v20  ;;  %773 = vtanh.f32 %v527_v22 }
 0x116   :  { %775 = vtanh.f32 %v529_v26 }
 0x117   :  { %v550_v24 = vadd.f32 0.5, %v542_v23 }
 0x118   :  { %v766_v25 = vpop.eup %765 }
 0x119   :  { %v558_v28 = vmul.f32 %v550_v24, %v455_v13  ;;  %v544_v29 = vmul.f32 0.5, %v766_v25 }
 0x11b   :  { %v565_v30 = vmul.f32 0.5, %v558_v28  ;;  %v552_v31 = vadd.f32 0.5, %v544_v29 }
 0x11c   :  { %v768_v32 = vpop.eup %767 }
 0x11d   :  { %777 = vtanh.f32 %v565_v30  ;;  %v560_v35 = vmul.f32 %v552_v31, %v459_v21  ;;  %v546_v36 = vmul.f32 0.5, %v768_v32 }
 0x11e   :  { %779 = vtanh.f32 %v531_v33 }
 0x11f   :  { %v566_v37 = vmul.f32 0.5, %v560_v35  ;;  %v554_v38 = vadd.f32 0.5, %v546_v36 }
 0x120   :  { %v770_v39 = vpop.eup %769 }
 0x121   :  { %781 = vtanh.f32 %v566_v37  ;;  %v562_v41 = vmul.f32 %v554_v38, %v465_v34  ;;  %v548_v42 = vmul.f32 0.5, %v770_v39  ;;  %v772_v43 = vpop.eup %771 }
 0x122   :  { %v541_v47 = vmul.f32 0.5, %v772_v43  ;;  %v774_v49 = vpop.eup %773 }
 0x123   :  { %v567_v44 = vmul.f32 0.5, %v562_v41  ;;  %v556_v45 = vadd.f32 0.5, %v548_v42  ;;  %v776_v51 = vpop.eup %775  ;;  %v543_v53 = vmul.f32 0.5, %v774_v49 }
 0x124   :  { %v549_v52 = vadd.f32 0.5, %v541_v47  ;;  %v545_v60 = vmul.f32 0.5, %v776_v51 }
 0x125   :  { %783 = vtanh.f32 %v567_v44  ;;  %v564_v48 = vmul.f32 %v556_v45, %v469_v46  ;;  %v551_v59 = vadd.f32 0.5, %v543_v53 }
 0x126   :  { %v557_v57 = vmul.f32 %v549_v52, %v453_v9  ;;  %v553_v2 = vadd.f32 0.5, %v545_v60 }
 0x127   :  { %v568_v50 = vmul.f32 0.5, %v564_v48  ;;  %v559_v0 = vmul.f32 %v551_v59, %v457_v17 }
 0x128   :  { %v561_v7 = vmul.f32 %v553_v2, %v463_v27 }
 0x129   :  { %785 = vtanh.f32 %v568_v50 }
 0x12a   :  { %v778_v54 = vpop.eup %777 }
 0x12b   :  { %v573_v55 = vmul.f32 0.5, %v778_v54  ;;  %v780_v56 = vpop.eup %779 }
 0x12c   :  { %v547_v3 = vmul.f32 0.5, %v780_v56 }
 0x12d   :  { %v577_v58 = vadd.f32 0.5, %v573_v55 }
 0x12e   :  { %v782_v61 = vpop.eup %781  ;;  %v555_v9 = vadd.f32 0.5, %v547_v3 }
 0x12f   :  { %v581_v62 = vmul.f32 %v577_v58, %v557_v57  ;;  %v574_v63 = vmul.f32 0.5, %v782_v61 }
 0x130   :  { %v563_v13 = vmul.f32 %v555_v9, %v467_v40 }
 0x131   :  { %585 = vst [vmem:[%s1020_s2] sm:$0xff] %v581_v62  ;;  %v578_v1 = vadd.f32 0.5, %v574_v63 }
 0x132   :  { %v784_v4 = vpop.eup %783 }
 0x133   :  { %v582_v5 = vmul.f32 %v578_v1, %v559_v0  ;;  %v575_v6 = vmul.f32 0.5, %v784_v4 }
 0x135   :  { %586 = vst [vmem:[%s1020_s2 + $0x8] sm:$0xff] %v582_v5  ;;  %v579_v8 = vadd.f32 0.5, %v575_v6 }
 0x136   :  { %v786_v10 = vpop.eup %785 }
 0x137   :  { %v583_v11 = vmul.f32 %v579_v8, %v561_v7  ;;  %v576_v12 = vmul.f32 0.5, %v786_v10 }
 0x139   :  { %587 = vst [vmem:[%s1020_s2 + $0x10] sm:$0xff] %v583_v11  ;;  %v580_v14 = vadd.f32 0.5, %v576_v12 }
 0x13b   :  { %v584_v15 = vmul.f32 %v580_v14, %v563_v13 }
 0x13d   :  { %588 = vst [vmem:[%s1020_s2 + $0x18] sm:$0xff] %v584_v15 }

</bundles_post_ra>
